<compile_context>
chip_gen: v6e
topology: v6e:2x2x1
jax: 0.10.0
libtpu: 0.0.40
codegen_flags: <defaults>
</compile_context>

<pallas_src>
import functools

import jax
import jax.numpy as jnp
from jax.experimental import pallas as pl
from jax.experimental.pallas import tpu as pltpu


def _flash_attention_kernel(q_ref, kt_ref, v_ref, o_ref, m_sc, l_sc, acc_sc, *,
                            seq_len: int, tk: int, mask_keys: bool):
    """One (query-tile, key-tile) step of self-attention with online softmax.

    q_ref  : (TQ, D)   pre-projected, pre-scaled queries (compute dtype)
    kt_ref : (D, TK)   pre-projected keys, already transposed (compute dtype)
    v_ref  : (TK, D)   pre-projected values (compute dtype)
    o_ref  : (TQ, D)   context output (f32)
    m_sc, l_sc : (TQ, 1) f32   running max / running softmax denominator
    acc_sc     : (TQ, D) f32   unnormalized context accumulator
    """
    ki = pl.program_id(1)

    @pl.when(ki == 0)
    def _init():
        m_sc[...] = jnp.full_like(m_sc, -jnp.inf)
        l_sc[...] = jnp.zeros_like(l_sc)
        acc_sc[...] = jnp.zeros_like(acc_sc)

    # scores[i, j] = <q[i, :], k[j, :]>.  K^T was produced once in the hoisted
    # projection pass, so this is a plain (M,K)x(K,N) MXU feed (no transpose).
    s = jnp.dot(q_ref[...], kt_ref[...], preferred_element_type=jnp.float32)

    if mask_keys:  # compile-time guard: only emitted when the sequence is padded
        col = ki * tk + jax.lax.broadcasted_iota(jnp.int32, s.shape, 1)
        s = jnp.where(col < seq_len, s, jnp.float32(-1e30))

    # Online (flash) softmax update, all in f32.
    m_prev = m_sc[...]
    m_new = jnp.maximum(m_prev, jnp.max(s, axis=-1, keepdims=True))
    alpha = jnp.exp(m_prev - m_new)
    p = jnp.exp(s - m_new)
    l_sc[...] = alpha * l_sc[...] + jnp.sum(p, axis=-1, keepdims=True)
    acc_sc[...] = alpha * acc_sc[...] + jnp.dot(
        p.astype(v_ref.dtype), v_ref[...], preferred_element_type=jnp.float32)
    m_sc[...] = m_new

    @pl.when(ki == pl.num_programs(1) - 1)
    def _finalize():
        # Exact divide over a (TQ, 1) column: essentially free, keeps the
        # output at full f32 accuracy (approx reciprocal bought nothing).
        o_ref[...] = (acc_sc[...] / l_sc[...]).astype(o_ref.dtype)


def _round_up(n: int, m: int) -> int:
    return ((n + m - 1) // m) * m


def _pick_tile(seq_len: int) -> int:
    """Sequence-tile heuristic; mildly chip-aware for long sequences."""
    if seq_len <= 512:
        return _round_up(seq_len, 8)          # single tile, sublane-aligned
    try:  # guarded: works on TPU, falls back cleanly in interpret/CPU mode
        vmem_cap = int(getattr(pltpu.get_tpu_info(), "vmem_capacity_bytes",
                               64 << 20))
    except Exception:
        vmem_cap = 64 << 20
    # v5e/v6e (128 MiB VMEM) can take bigger key tiles; keep headroom under
    # v7x's 64 MiB physical / 32 MiB scoped-default VMEM.
    return 512 if vmem_cap >= (100 << 20) else 256


def self_attention_v1(x, w_query, w_key, w_value, *, tile=None,
                      compute_dtype=jnp.bfloat16):
    """Pallas TPU forward pass matching SelfAttention_v1.forward.

    x        : (seq, d_in)  float32
    w_query / w_key / w_value : (d_in, d_out)
    returns  : (seq, d_out) float32
    """
    seq_len, d_in = x.shape
    d_out = w_query.shape[1]

    # ---- Hoisted projections: run ONCE, outside the flash inner loop. ------
    # The 1/sqrt(d_out) softmax scale is folded into Q here (an (S, D)
    # multiply instead of (S, S)), and K^T is materialized once.
    scale = jnp.float32(1.0) / jnp.sqrt(jnp.float32(d_out))
    q = (x @ w_query) * scale          # (S, d_out) f32
    k = x @ w_key                      # (S, d_out) f32
    v = x @ w_value                    # (S, d_out) f32

    # ---- Tiling / padding. --------------------------------------------------
    if tile is None:
        tile = _pick_tile(seq_len)
    tile = max(8, _round_up(tile, 8))
    if _round_up(seq_len, tile) > tile:     # more than one tile along keys
        tile = _round_up(tile, 128)         # keep the K^T lane dim 128-aligned
    s_pad = _round_up(seq_len, tile)
    nt = s_pad // tile
    mask_keys = s_pad != seq_len

    # Pad d_out to a lane multiple (>=128): lane-aligned score matmul and
    # lane-dense attn@V / output stores.  Zero-padded K/V columns contribute
    # zeros; padded output columns/rows are sliced off below.
    dout_pad = max(128, _round_up(d_out, 128))

    def _pad(a):
        return jnp.pad(a, ((0, s_pad - seq_len), (0, dout_pad - d_out)))

    # bf16 streams (half the DMA bytes, native MXU path) with f32 accumulation.
    q_p = _pad(q).astype(compute_dtype)       # (s_pad, dout_pad)
    kt_p = _pad(k).T.astype(compute_dtype)    # (dout_pad, s_pad)  K^T, once
    v_p = _pad(v).astype(compute_dtype)       # (s_pad, dout_pad)

    kernel = functools.partial(_flash_attention_kernel, seq_len=seq_len,
                               tk=tile, mask_keys=mask_keys)

    # Explicit VMEM budget derived from the actual tile bytes (double-buffered
    # streams + f32 output/accumulator), with headroom for internal scratch.
    elt = jnp.dtype(compute_dtype).itemsize
    buf_bytes = (3 * 2 * tile * dout_pad * elt    # Q, K^T, V (double-buffered)
                 + 2 * tile * dout_pad * 4        # output (double-buffered)
                 + tile * dout_pad * 4            # acc scratch
                 + 2 * tile * 4)                  # m / l scratch
    vmem_limit = int(min(max(2 * buf_bytes + (2 << 20), 8 << 20), 64 << 20))

    cost = pl.CostEstimate(
        # Only q.kT and attn@V run in the kernel now (projections hoisted).
        flops=int(4 * s_pad * s_pad * dout_pad),
        transcendentals=int(s_pad * s_pad + 2 * s_pad * nt),
        bytes_accessed=int(elt * s_pad * dout_pad * (1 + 2 * nt)
                           + 4 * s_pad * dout_pad),
    )

    out_padded = pl.pallas_call(
        kernel,
        out_shape=jax.ShapeDtypeStruct((s_pad, dout_pad), jnp.float32),
        grid=(nt, nt),
        in_specs=[
            # TODO(synk): once pipeline_mode=pl.Buffered(1) is verified on the
            # target jax build, single-buffer the Q tile (constant along ki).
            pl.BlockSpec((tile, dout_pad), lambda qi, ki: (qi, 0)),   # Q
            pl.BlockSpec((dout_pad, tile), lambda qi, ki: (0, ki)),   # K^T
            pl.BlockSpec((tile, dout_pad), lambda qi, ki: (ki, 0)),   # V
        ],
        out_specs=pl.BlockSpec((tile, dout_pad), lambda qi, ki: (qi, 0)),
        scratch_shapes=[
            pltpu.VMEM((tile, 1), jnp.float32),          # running max
            pltpu.VMEM((tile, 1), jnp.float32),          # running denominator
            pltpu.VMEM((tile, dout_pad), jnp.float32),   # context accumulator
        ],
        compiler_params=pltpu.CompilerParams(
            dimension_semantics=("parallel", "arbitrary"),
            vmem_limit_bytes=vmem_limit),
        cost_estimate=cost,
    )(q_p, kt_p, v_p)

    return out_padded[:seq_len, :d_out]


def _reference(x, w_query, w_key, w_value):
    keys = x @ w_key
    queries = x @ w_query
    values = x @ w_value
    scores = queries @ keys.T
    weights = jax.nn.softmax(scores / (keys.shape[-1] ** 0.5), axis=-1)
    return weights @ values


if __name__ == "__main__":
    # Same inputs as the chapter3.py snippet.
    inputs = jnp.array(
        [[0.43, 0.15, 0.89],
         [0.55, 0.87, 0.66],
         [0.57, 0.85, 0.64],
         [0.22, 0.58, 0.33],
         [0.77, 0.25, 0.10],
         [0.05, 0.80, 0.55]], dtype=jnp.float32)

    d_in = inputs.shape[1]   # 3
    d_out = 2

    # Deterministic parameter init (uniform [0,1), like torch.rand).
    key = jax.random.PRNGKey(0)
    kq, kk, kv = jax.random.split(key, 3)
    W_query = jax.random.uniform(kq, (d_in, d_out), dtype=jnp.float32)
    W_key = jax.random.uniform(kk, (d_in, d_out), dtype=jnp.float32)
    W_value = jax.random.uniform(kv, (d_in, d_out), dtype=jnp.float32)

    ref = _reference(inputs, W_query, W_key, W_value)

    # 1) Default path: bf16 streamed tiles, f32 accumulation (bf16 tolerance).
    out_bf16 = jax.block_until_ready(
        self_attention_v1(inputs, W_query, W_key, W_value))
    assert out_bf16.shape == (inputs.shape[0], d_out)
    assert jnp.allclose(out_bf16, ref, rtol=3e-2, atol=3e-3), (out_bf16, ref)

    # 2) f32 streams: matches the reference up to matmul-precision rounding.
    out_f32 = jax.block_until_ready(
        self_attention_v1(inputs, W_query, W_key, W_value,
                          compute_dtype=jnp.float32))
    assert jnp.allclose(out_f32, ref, rtol=1e-2, atol=1e-3), (out_f32, ref)

    # 3) Tiled / masked flash path: seq=200 with tile=128 -> 2x2 grid, the
    #    last key tile carries 56 padded (masked) keys, padded query rows are
    #    sliced off.  All block shapes stay (8,128)-legal for hardware.
    x2 = jax.random.uniform(jax.random.PRNGKey(1), (200, d_in),
                            dtype=jnp.float32)
    out2 = jax.block_until_ready(
        self_attention_v1(x2, W_query, W_key, W_value, tile=128,
                          compute_dtype=jnp.float32))
    ref2 = _reference(x2, W_query, W_key, W_value)
    assert out2.shape == (200, d_out)
    assert jnp.allclose(out2, ref2, rtol=1e-2, atol=1e-3), (out2, ref2)

    print("KERNEL_OK")
</pallas_src>

<mosaic_0001>
module attributes {stable_mosaic.version = 11 : i64} {
  func.func @_flash_attention_kernel(%arg0: i32, %arg1: i32, %arg2: memref<8x128xbf16, #tpu.memory_space<vmem>>, %arg3: memref<128x8xbf16, #tpu.memory_space<vmem>>, %arg4: memref<8x128xbf16, #tpu.memory_space<vmem>>, %arg5: memref<8x128xf32, #tpu.memory_space<vmem>>, %arg6: memref<8x1xf32, #tpu.memory_space<vmem>>, %arg7: memref<8x1xf32, #tpu.memory_space<vmem>>, %arg8: memref<8x128xf32, #tpu.memory_space<vmem>>) attributes {dimension_semantics = [#tpu.dimension_semantics<parallel>, #tpu.dimension_semantics<arbitrary>], iteration_bounds = array<i64: 1, 1>, scalar_prefetch = 0 : i64, scratch_operands = 3 : i64, tpu.core_type = #tpu.core_type<tc>, window_params = [{transform_indices = @transform_0, window_bounds = array<i64: 8, 128>}, {transform_indices = @transform_1, window_bounds = array<i64: 128, 8>}, {transform_indices = @transform_2, window_bounds = array<i64: 8, 128>}, {transform_indices = @transform_3, window_bounds = array<i64: 8, 128>}]} {
    %c0_i32 = arith.constant 0 : i32
    %0 = arith.cmpi eq, %arg1, %c0_i32 : i32
    %1 = arith.extui %0 : i1 to i32
    %c0_i32_0 = arith.constant 0 : i32
    %2 = arith.cmpi ne, %1, %c0_i32_0 : i32
    scf.if %2 {
      %cst_24 = arith.constant 0xFF800000 : f32
      %41 = vector.broadcast %cst_24 : f32 to vector<8x1xf32>
      %c0_25 = arith.constant 0 : index
      %c0_26 = arith.constant 0 : index
      %42 = vector.load %arg6[%c0_25, %c0_26] : memref<8x1xf32, #tpu.memory_space<vmem>>, vector<8x1xf32>
      tpu.vector_store %arg6[%c0_25, %c0_26], %41 {strides = array<i32>} : memref<8x1xf32, #tpu.memory_space<vmem>>, vector<8x1xf32>,
      %cst_27 = arith.constant 0.000000e+00 : f32
      %43 = vector.broadcast %cst_27 : f32 to vector<8x1xf32>
      %c0_28 = arith.constant 0 : index
      %c0_29 = arith.constant 0 : index
      %44 = vector.load %arg7[%c0_28, %c0_29] : memref<8x1xf32, #tpu.memory_space<vmem>>, vector<8x1xf32>
      tpu.vector_store %arg7[%c0_28, %c0_29], %43 {strides = array<i32>} : memref<8x1xf32, #tpu.memory_space<vmem>>, vector<8x1xf32>,
      %cst_30 = arith.constant 0.000000e+00 : f32
      %45 = vector.broadcast %cst_30 : f32 to vector<8x128xf32>
      %c0_31 = arith.constant 0 : index
      %c0_32 = arith.constant 0 : index
      %46 = vector.load %arg8[%c0_31, %c0_32] : memref<8x128xf32, #tpu.memory_space<vmem>>, vector<8x128xf32>
      tpu.vector_store %arg8[%c0_31, %c0_32], %45 {strides = array<i32>} : memref<8x128xf32, #tpu.memory_space<vmem>>, vector<8x128xf32>,
    } else {
    }
    %c0 = arith.constant 0 : index
    %c0_1 = arith.constant 0 : index
    %3 = vector.load %arg2[%c0, %c0_1] : memref<8x128xbf16, #tpu.memory_space<vmem>>, vector<8x128xbf16>
    %c0_2 = arith.constant 0 : index
    %c0_3 = arith.constant 0 : index
    %4 = vector.load %arg3[%c0_2, %c0_3] : memref<128x8xbf16, #tpu.memory_space<vmem>>, vector<128x8xbf16>
    %cst = arith.constant dense<0.000000e+00> : vector<8x8xf32>
    %5 = tpu.matmul %3, %4, %cst {dimension_numbers = #tpu.dot_dimension_numbers<[1], [0], [0], [1], [0, 0, 1, 1], [], []>} : vector<8x128xbf16>, vector<128x8xbf16>, vector<8x8xf32> -> vector<8x8xf32>
    %c8_i32 = arith.constant 8 : i32
    %6 = arith.muli %arg1, %c8_i32 : i32
    %7 = tpu.iota {dimensions = array<i32: 1>} : vector<8x8xi32>
    %8 = vector.broadcast %6 : i32 to vector<8x8xi32>
    %9 = arith.addi %8, %7 : vector<8x8xi32>
    %c6_i32 = arith.constant 6 : i32
    %10 = vector.broadcast %c6_i32 : i32 to vector<8x8xi32>
    %11 = arith.cmpi slt, %9, %10 : vector<8x8xi32>
    %cst_4 = arith.constant -1.000000e+30 : f32
    %12 = vector.broadcast %cst_4 : f32 to vector<8x8xf32>
    %13 = arith.select %11, %5, %12 : vector<8x8xi1>, vector<8x8xf32>
    %c0_5 = arith.constant 0 : index
    %c0_6 = arith.constant 0 : index
    %14 = vector.load %arg6[%c0_5, %c0_6] : memref<8x1xf32, #tpu.memory_space<vmem>>, vector<8x1xf32>
    %cst_7 = arith.constant dense<0xFF800000> : vector<8xf32>
    %15 = vector.multi_reduction <maximumf>, %13, %cst_7 [1] : vector<8x8xf32> to vector<8xf32>
    %16 = vector.shape_cast %15 : vector<8xf32> to vector<8x1xf32>
    %17 = arith.maximumf %14, %16 : vector<8x1xf32>
    %18 = arith.subf %14, %17 : vector<8x1xf32>
    %19 = math.exp %18 : vector<8x1xf32>
    %20 = vector.broadcast %17 : vector<8x1xf32> to vector<8x8xf32>
    %21 = arith.subf %13, %20 : vector<8x8xf32>
    %22 = math.exp %21 : vector<8x8xf32>
    %c0_8 = arith.constant 0 : index
    %c0_9 = arith.constant 0 : index
    %23 = vector.load %arg7[%c0_8, %c0_9] : memref<8x1xf32, #tpu.memory_space<vmem>>, vector<8x1xf32>
    %24 = arith.mulf %19, %23 : vector<8x1xf32>
    %cst_10 = arith.constant dense<0.000000e+00> : vector<8xf32>
    %25 = vector.multi_reduction <add>, %22, %cst_10 [1] : vector<8x8xf32> to vector<8xf32>
    %26 = vector.shape_cast %25 : vector<8xf32> to vector<8x1xf32>
    %27 = arith.addf %24, %26 : vector<8x1xf32>
    %c0_11 = arith.constant 0 : index
    %c0_12 = arith.constant 0 : index
    %28 = vector.load %arg7[%c0_11, %c0_12] : memref<8x1xf32, #tpu.memory_space<vmem>>, vector<8x1xf32>
    tpu.vector_store %arg7[%c0_11, %c0_12], %27 {strides = array<i32>} : memref<8x1xf32, #tpu.memory_space<vmem>>, vector<8x1xf32>,
    %c0_13 = arith.constant 0 : index
    %c0_14 = arith.constant 0 : index
    %29 = vector.load %arg8[%c0_13, %c0_14] : memref<8x128xf32, #tpu.memory_space<vmem>>, vector<8x128xf32>
    %30 = vector.broadcast %19 : vector<8x1xf32> to vector<8x128xf32>
    %31 = arith.mulf %30, %29 : vector<8x128xf32>
    %32 = arith.truncf %22 : vector<8x8xf32> to vector<8x8xbf16>
    %c0_15 = arith.constant 0 : index
    %c0_16 = arith.constant 0 : index
    %33 = vector.load %arg4[%c0_15, %c0_16] : memref<8x128xbf16, #tpu.memory_space<vmem>>, vector<8x128xbf16>
    %cst_17 = arith.constant dense<0.000000e+00> : vector<8x128xf32>
    %34 = tpu.matmul %32, %33, %cst_17 {dimension_numbers = #tpu.dot_dimension_numbers<[1], [0], [0], [1], [0, 0, 1, 1], [], []>} : vector<8x8xbf16>, vector<8x128xbf16>, vector<8x128xf32> -> vector<8x128xf32>
    %35 = arith.addf %31, %34 : vector<8x128xf32>
    %c0_18 = arith.constant 0 : index
    %c0_19 = arith.constant 0 : index
    %36 = vector.load %arg8[%c0_18, %c0_19] : memref<8x128xf32, #tpu.memory_space<vmem>>, vector<8x128xf32>
    tpu.vector_store %arg8[%c0_18, %c0_19], %35 {strides = array<i32>} : memref<8x128xf32, #tpu.memory_space<vmem>>, vector<8x128xf32>,
    %c0_20 = arith.constant 0 : index
    %c0_21 = arith.constant 0 : index
    %37 = vector.load %arg6[%c0_20, %c0_21] : memref<8x1xf32, #tpu.memory_space<vmem>>, vector<8x1xf32>
    tpu.vector_store %arg6[%c0_20, %c0_21], %17 {strides = array<i32>} : memref<8x1xf32, #tpu.memory_space<vmem>>, vector<8x1xf32>,
    %c0_i32_22 = arith.constant 0 : i32
    %38 = arith.cmpi eq, %arg1, %c0_i32_22 : i32
    %39 = arith.extui %38 : i1 to i32
    %c0_i32_23 = arith.constant 0 : i32
    %40 = arith.cmpi ne, %39, %c0_i32_23 : i32
    scf.if %40 {
      %c0_24 = arith.constant 0 : index
      %c0_25 = arith.constant 0 : index
      %41 = vector.load %arg8[%c0_24, %c0_25] : memref<8x128xf32, #tpu.memory_space<vmem>>, vector<8x128xf32>
      %c0_26 = arith.constant 0 : index
      %c0_27 = arith.constant 0 : index
      %42 = vector.load %arg7[%c0_26, %c0_27] : memref<8x1xf32, #tpu.memory_space<vmem>>, vector<8x1xf32>
      %43 = vector.broadcast %42 : vector<8x1xf32> to vector<8x128xf32>
      %44 = arith.divf %41, %43 : vector<8x128xf32>
      %c0_28 = arith.constant 0 : index
      %c0_29 = arith.constant 0 : index
      %45 = vector.load %arg5[%c0_28, %c0_29] : memref<8x128xf32, #tpu.memory_space<vmem>>, vector<8x128xf32>
      tpu.vector_store %arg5[%c0_28, %c0_29], %44 {strides = array<i32>} : memref<8x128xf32, #tpu.memory_space<vmem>>, vector<8x128xf32>,
    } else {
    }
    return
  }
  func.func @transform_0(%arg0: i32, %arg1: i32) -> (i32, i32) {
    %c0_i32 = arith.constant 0 : i32
    %c0_i32_0 = arith.constant 0 : i32
    return %arg0, %c0_i32 : i32, i32
  }
  func.func @transform_1(%arg0: i32, %arg1: i32) -> (i32, i32) {
    %c0_i32 = arith.constant 0 : i32
    %c0_i32_0 = arith.constant 0 : i32
    return %c0_i32, %arg1 : i32, i32
  }
  func.func @transform_2(%arg0: i32, %arg1: i32) -> (i32, i32) {
    %c0_i32 = arith.constant 0 : i32
    %c0_i32_0 = arith.constant 0 : i32
    return %arg1, %c0_i32 : i32, i32
  }
  func.func @transform_3(%arg0: i32, %arg1: i32) -> (i32, i32) {
    %c0_i32 = arith.constant 0 : i32
    %c0_i32_0 = arith.constant 0 : i32
    return %arg0, %c0_i32 : i32, i32
  }
}

</mosaic_0001>

<bundles_post_ra>
// kernel: tpu_custom_call.1
= control target key start
LH: loop header
LB: loop body
LE: loop exit
PB: predicated region body
PF: predicated region fallthrough
CT: control target
= control target key end

     0   :  { %v336_v1 = vmov 0.0   ;;  %vm337_vm0 = vmmov 0   ;;  %s401_s0 = inlined_call_operand.vmem [shape: bf16[8,128], index: 0, kind: input, shape index: {}]   ;;  %s402_s1 = inlined_call_operand.vmem [shape: bf16[128,8], index: 1, kind: input, shape index: {}]   ;;  %s403_s2 = inlined_call_operand.vmem [shape: bf16[8,128], index: 2, kind: input, shape index: {}]   ;;  %s404_s3 = inlined_call_operand.hbm [shape: f32[8,128], index: 3, kind: output, shape index: {}]  }
   0x1   :  { %v300_v0 = vld [vmem:[%s402_s1 + $0x38] sm:$0xff]   ;;  %267 = vmatprep.subr.bf16.mxu0 %v336_v1  ;;  %287 = vmatprep.subr.bf16.mxu1 %v336_v1  ;;  %v301_v2 = vld [vmem:[%s402_s1 + $0x30] sm:$0xff]   ;;  %v302_v3 = vld [vmem:[%s402_s1 + $0x28] sm:$0xff]  }
   0x2   :  { %268 = vmatpush3.bf16.msra.mxu0 %v300_v0  ;;  %283 = vmatprep.mubr.msk.bf16.mxu0 %vm337_vm0, %v336_v1 }
   0x3   :  { %269 = vmatprep.subr.bf16.mxu0 %v336_v1  ;;  %289 = vmatprep.mubr.msk.bf16.mxu1 %vm337_vm0, %v336_v1 }
   0x6   :  { %270 = vmatpush3.bf16.msra.mxu0 %v301_v2 }
   0x7   :  { %271 = vmatprep.subr.bf16.mxu0 %v336_v1 }
   0x8   :  { %8 = vsyncpa [#allocation6], 0  ;;  %v303_v4 = vld [vmem:[%s402_s1 + $0x20] sm:$0xff]   ;;  %v304_v5 = vld [vmem:[%s402_s1 + $0x18] sm:$0xff]   ;;  %v130_v10 = vlaneseq  ;;  %vm137_vm2 = vcmask 64512   ;;  %vm20_vm3 = vcmask 7168  }
   0x9   :  { %v305_v6 = vld [vmem:[%s402_s1 + $0x10] sm:$0xff]   ;;  %v306_v7 = vld [vmem:[%s402_s1 + $0x8] sm:$0xff]   ;;  %v307_v8 = vld [vmem:[%s402_s1] sm:$0xff]   ;;  %v338_v17 = vmov -inf   ;;  %22 = vst.msk [vmem:[#allocation3] sm:$0xff] %vm20_vm3, %v336_v1  ;;  %v339_v19 = vmov 0  }
   0xa   :  { %272 = vmatpush3.bf16.msra.mxu0 %v302_v3  ;;  %v24_v9 = vld [vmem:[%s401_s0] sm:$0xf]  ;;  %v131_v11 = vand.u32 127, %v130_v10  ;;  %21 = vst.msk [vmem:[#allocation2] sm:$0xff] %vm20_vm3, %v338_v17  ;;  %298 = vset.pattern.permute.xlu0 %v339_v19  ;;  %vm173_vm4 = vcmask 1043456  }
   0xb   :  { %273 = vmatprep.subr.bf16.mxu0 %v336_v1  ;;  %299 = vset.pattern.permute.xlu1 %v339_v19  ;;  %v169_v24 = vld [vmem:[%s403_s2] sm:$0xf]  ;;  %s340_s2 = smov [#allocation5]  }
   0xc   :  { %vm134_vm1 = vcmp.lt.s32.totalorder %v131_v11, 6  ;;  %v175_v25 = vsel %vm173_vm4, %v169_v24, 0  ;;  %s239_s30 = sshll.u32 %s340_s2, 4  ;;  %s240_s30 = int_to_ptr.vmem [resolvable:$true] %s239_s30 }
   0xd   :  { %288 = vmatpush3.bf16.msra.mxu1 %v175_v25  ;;  %s314_s4 = scalar_lea.vmem %s240_s30, 128  ;;  %p319_p1 = scmp.lt.s32.totalorder %s240_s30, %s240_s30 }
   0xe   :  { %274 = vmatpush3.bf16.msra.mxu0 %v303_v4  ;;  %p315_p0 = scmp.ne.s32.totalorder %s240_s30, %s314_s4  ;;  %p320_p2 = scmp.lt.s32.totalorder %s314_s4, %s314_s4 }
   0xf   :  { %275 = vmatprep.subr.bf16.mxu0 %v336_v1 }
  0x10   :  { %v153_v34 = vld [vmem:[#allocation3] sm:$0xff]  ;;  %p321_p3 = por %p320_p2, %p319_p1 }
  0x11   :  { %v136_v20 = vld [vmem:[#allocation2] sm:$0xff] }
  0x12   :  { %276 = vmatpush3.bf16.msra.mxu0 %v304_v5  ;;  %p322_p4 = pnand %p321_p3, %p315_p0 }
  0x13   :  { %277 = vmatprep.subr.bf16.mxu0 %v336_v1 }
  0x16   :  { %278 = vmatpush3.bf16.msra.mxu0 %v305_v6 }
  0x17   :  { %279 = vmatprep.subr.bf16.mxu0 %v336_v1 }
  0x1a   :  { %280 = vmatpush3.bf16.msra.mxu0 %v306_v7 }
  0x1b   :  { %281 = vmatprep.subr.bf16.mxu0 %v336_v1 }
  0x1e   :  { %282 = vmatpush3.bf16.msra.mxu0 %v307_v8 }
  0x21   :  { %284 = vmatmul.mubr.bf16.vlgmr.msra.gmra.mxu0 %v24_v9 }
  0xe1   :  { %v123_v12 = vpop.f32.mrf.mxu0 }
  0xe2   :  { %v135_v13 = vsel %vm134_vm1, %v123_v12, -1e+30 }
  0xe3   :  { %v285_v14 = vpop.f32.mrf.mxu0  ;;  %v138_v15 = vsel %vm137_vm2, %v135_v13, -inf }
  0xe4   :  { %139 = vmax.xlane.f32.xlu0 %v138_v15 }
  0xe5   :  { %v126_v16 = vpop.f32.mrf.mxu0 }
  0xe7   :  { %v286_v18 = vpop.f32.mrf.mxu0 }
 0x16d   :  { %v140_v21 = vpop.xlane.xlu0 %139 }
 0x16e   :  { %v141_v22 = vmax.f32 %v136_v20, %v140_v21 }
 0x170   :  { %v142_v23 = vsub.f32 %v136_v20, %v141_v22  ;;  %219 = vst.msk [vmem:[#allocation2] sm:$0xff] %vm20_vm3, %v141_v22  ;;  %147 = vperm.xlu0 %298, %v141_v22  }
 0x172   :  { %v143_v32 = vmul.f32 1.442695, %v142_v23 }
 0x1eb   :  { %v148_v26 = vpop.permute.xlu0 %147 }
 0x1ec   :  { %v150_v27 = vsub.f32 %v135_v13, %v148_v26 }
 0x1ee   :  { %v151_v28 = vmul.f32 1.442695, %v150_v27 }
 0x1f0   :  { %308 = vpow2.f32 %v151_v28 }
 0x1f1   :  { %310 = vpow2.f32 %v143_v32 }
 0x1fd   :  { %v309_v29 = vpop.eup %308 }
 0x1fe   :  { %v155_v30 = vsel %vm137_vm2, %v309_v29, 0.0  ;;  %v168_v31 = vpack.c.bf16 %v309_v29, %v309_v29  ;;  %v311_v33 = vpop.eup %310 }
 0x1ff   :  { %156 = vadd.xlane.f32.xlu1 %v155_v30  ;;  %v154_v35 = vmul.f32 %v311_v33, %v153_v34 }
 0x200   :  { %290 = vmatmul.mubr.msk.bf16.vlgmr.msra.gmra.mxu1 %vm137_vm2, %v168_v31 }
 0x288   :  { %v157_v36 = vpop.xlane.xlu1 %156 }
 0x289   :  { %v158_v37 = vadd.f32 %v157_v36, %v154_v35 }
 0x28b   :  { %160 = vst.msk [vmem:[#allocation3] sm:$0xff] %vm20_vm3, %v158_v37 }
 0x292   :  { %v224_v38 = vld [vmem:[#allocation3] sm:$0xff] }
 0x293   :  { %227 = vperm.xlu1 %299, %v224_v38  }
 0x297   :  { %164 = vperm.xlu1 %299, %v311_v33  }
 0x2c0   :  { %v211_v39 = vpop.f32.mrf.mxu1 }
 0x2c2   :  { %v291_v40 = vpop.f32.mrf.mxu1 }
 0x2c4   :  { %v214_v41 = vpop.f32.mrf.mxu1 }
 0x2c6   :  { %v292_v42 = vpop.f32.mrf.mxu1 }
 0x30e   :  { %v228_v43 = vpop.permute.xlu1 %227 }
 0x30f   :  { %312 = vrcp.f32 %v228_v43 }
 0x312   :  { %v165_v44 = vpop.permute.xlu1 %164 }
 0x313   :  { %v167_v45 = vmul.f32 0.0, %v165_v44 }
 0x315   :  { %v217_v46 = vadd.f32 %v211_v39, %v167_v45 }
 0x31c   :  { %v313_v47 = vpop.eup %312 }
 0x31d   :  { %v231_v48 = vmul.f32 %v313_v47, %v217_v46 }
 0x31f   :  { %232 = vst [vmem:[#allocation5] sm:$0xff] %v231_v48 }
 0x320   :  { %325 = shalt.err (!%p322_p4)
}
 0x321   :  { %242 = dma.vmem_to_hbm [thread:$0]  %s240_s30, 128, %s404_s3, [#allocation6]  }
 0x322   :  { %334 = dma.done.wait [#allocation6], 128  }
 0x323   :  { %335 = vsyncadd [#allocation6], 4294967168 }
 0x324   :  { %246 = vsyncpa [#allocation6], 1 }

</bundles_post_ra>
